<compile_context>
chip_gen: v6e
topology: v6e:2x2x1
jax: 0.10.0
libtpu: 0.0.40
codegen_flags: <defaults>
</compile_context>

<pallas_src>
import functools

import jax
import jax.numpy as jnp
from jax.experimental import pallas as pl
from jax.experimental.pallas import tpu as pltpu


def _round_up(x: int, m: int) -> int:
    return (x + m - 1) // m * m


def _sce_kernel(*refs, tm, W, C, g, n_blk, P, K, rows, scale, packed, need_mask):
    if packed:
        a_ref, b_ref, ones_ref, out_ref, acc_ref = refs
    else:
        a_ref, b_ref, out_ref, acc_ref = refs
        ones_ref = None

    p = pl.program_id(0)
    k = pl.program_id(1)
    blk = p * K + k

    @pl.when(k == 0)
    def _init():
        acc_ref[...] = jnp.zeros_like(acc_ref)

    def _accumulate():
        a = a_ref[...].astype(jnp.float32)
        b = b_ref[...].astype(jnp.float32)

        if packed:
            lane = jax.lax.broadcasted_iota(jnp.int32, (tm, W), 1)

            def seg_max(x):
                # XOR-butterfly max over each aligned group of C lanes
                # (groups never leak since C is a power of two and W == 128).
                m = x
                d = 1
                while d < C:
                    fwd = pltpu.roll(m, shift=W - d, axis=1)  # lane i -> m[(i+d) % W]
                    bwd = pltpu.roll(m, shift=d, axis=1)      # lane i -> m[(i-d) % W]
                    m = jnp.maximum(m, jnp.where((lane & d) == 0, fwd, bwd))
                    d *= 2
                return m

            m_a = seg_max(a)
            m_b = seg_max(b)
        else:
            m_a = jnp.max(a, axis=-1, keepdims=True)
            m_b = jnp.max(b, axis=-1, keepdims=True)

        a_sh = a - m_a
        b_sh = b - m_b
        ea = jnp.exp(a_sh)
        eb = jnp.exp(b_sh)

        if packed:
            ones = ones_ref[...]  # (W, g) bf16 block-diagonal 0/1 matrix

            def gsum(x):
                # Exact-in-f32 segmented sums on the MXU: decompose the f32
                # operand into three bf16 pieces (exact split), matmul each
                # against the 0/1 matrix with f32 accumulation, add results.
                total = None
                rem = x
                for _ in range(3):
                    part = rem.astype(jnp.bfloat16)
                    rem = rem - part.astype(jnp.float32)
                    s = jnp.dot(part, ones, preferred_element_type=jnp.float32)
                    total = s if total is None else total + s
                return total  # (tm, g)
        else:

            def gsum(x):
                return jnp.sum(x, axis=-1, keepdims=True)  # (tm, 1)

        sa = gsum(ea)
        sb = gsum(eb)
        cab = gsum(ea * b_sh)
        cba = gsum(eb * a_sh)

        term = (cab * pl.reciprocal(sa, approx=False)
                + cba * pl.reciprocal(sb, approx=False)
                - jnp.log(sa) - jnp.log(sb))               # (tm, g)

        if need_mask:
            r0 = blk * (tm * g)
            ridx = (r0
                    + jax.lax.broadcasted_iota(jnp.int32, (tm, g), 0) * g
                    + jax.lax.broadcasted_iota(jnp.int32, (tm, g), 1))
            term = jnp.where(ridx < rows, term, 0.0)

        # Per-lane accumulation; the cross-lane reduce happens once at the end.
        acc_ref[...] += jnp.sum(term, axis=0, keepdims=True)

    if P * K != n_blk:
        # Clamped duplicate tail block on the second partition -> skip it.
        @pl.when(blk < n_blk)
        def _guarded():
            _accumulate()
    else:
        _accumulate()

    @pl.when(k == K - 1)
    def _finish():
        out_ref[...] = (jnp.sum(acc_ref[...], keepdims=True) * scale).reshape(1, 1, 1)


def symmetric_cross_entropy(trans_outputs: jax.Array, ori_outputs_trans: jax.Array) -> jax.Array:
    assert trans_outputs.shape == ori_outputs_trans.shape
    shape = trans_outputs.shape
    C = int(shape[-1])
    R = 1
    for d in shape[:-1]:
        R *= int(d)
    total = R * C
    scale = -0.5 / float(total)

    # Lane packing: g logical rows side by side on the 128 lanes when C | 128.
    packed = (2 <= C <= 64) and (128 % C == 0)
    g = 128 // C if packed else 1
    W = g * C

    a2 = trans_outputs.reshape(R, C)
    b2 = ori_outputs_trans.reshape(R, C)
    pad_rows = (-R) % g
    if pad_rows:  # only for awkward row counts; padded rows are masked in-kernel
        a2 = jnp.pad(a2, ((0, pad_rows), (0, 0)))
        b2 = jnp.pad(b2, ((0, pad_rows), (0, 0)))
    Rp = (R + pad_rows) // g
    a2 = a2.reshape(Rp, W)
    b2 = b2.reshape(Rp, W)

    # Row tile sized for ~1 MiB of f32 working set per input tile: large enough
    # to amortize the ~0.35us/step pipeline overhead, small enough that
    # 2 inputs x 2 buffers + f32 temporaries fit easily in VMEM on v5e/v6e/v7x.
    row_align = 8 if a2.dtype.itemsize >= 4 else 16
    lane_padded_w = _round_up(W, 128)
    tile_bytes = 1 << 20
    tm = max(row_align, (tile_bytes // (lane_padded_w * 4)) // row_align * row_align)
    tm = min(tm, _round_up(Rp, row_align))

    n_blk = pl.cdiv(Rp, tm)
    P = 2 if n_blk >= 2 else 1          # leading "parallel" axis -> both TCs on v7x
    K = pl.cdiv(n_blk, P)
    need_mask = (pad_rows != 0) or (Rp % tm != 0)

    if P * K == n_blk:
        def row_map(p, k):
            return (p * K + k, 0)
    else:
        def row_map(p, k):  # clamp the duplicate tail block (skipped in-kernel)
            return (jnp.minimum(p * K + k, n_blk - 1), 0)

    in_specs = [pl.BlockSpec((tm, W), row_map),
                pl.BlockSpec((tm, W), row_map)]
    inputs = [a2, b2]
    if packed:
        ones = (jnp.arange(W)[:, None] // C == jnp.arange(g)[None, :]).astype(jnp.bfloat16)
        in_specs.append(pl.BlockSpec((W, g), lambda p, k: (0, 0)))
        inputs.append(ones)

    kernel = functools.partial(
        _sce_kernel, tm=tm, W=W, C=C, g=g, n_blk=n_blk, P=P, K=K,
        rows=R, scale=scale, packed=packed, need_mask=need_mask)

    partials = pl.pallas_call(
        kernel,
        out_shape=jax.ShapeDtypeStruct((P, 1, 1), jnp.float32),
        grid_spec=pltpu.PrefetchScalarGridSpec(
            num_scalar_prefetch=0,
            grid=(P, K),
            in_specs=in_specs,
            out_specs=pl.BlockSpec((1, 1, 1), lambda p, k: (p, 0, 0)),
            scratch_shapes=[pltpu.VMEM((1, g), jnp.float32)],
        ),
        compiler_params=pltpu.CompilerParams(
            dimension_semantics=("parallel", "arbitrary"),
            vmem_limit_bytes=48 * 1024 * 1024,
        ),
    )(*inputs)

    return jnp.sum(partials)


def _reference(a, b):
    p_a = jax.nn.softmax(a, axis=-1)
    p_b = jax.nn.softmax(b, axis=-1)
    ls_a = jax.nn.log_softmax(a, axis=-1)
    ls_b = jax.nn.log_softmax(b, axis=-1)
    l1 = -jnp.mean(p_a * ls_b)
    l2 = -jnp.mean(p_b * ls_a)
    return 0.5 * (l1 + l2)


def _check(key, shape, dtype):
    k1, k2 = jax.random.split(key)
    a = jax.random.normal(k1, shape, dtype=jnp.float32).astype(dtype)
    b = jax.random.normal(k2, shape, dtype=jnp.float32).astype(dtype)
    got = jax.block_until_ready(symmetric_cross_entropy(a, b))
    want = _reference(a.astype(jnp.float32), b.astype(jnp.float32))
    assert jnp.allclose(got, want, rtol=2e-5, atol=2e-6), (shape, dtype, got, want)


if __name__ == "__main__":
    key = jax.random.PRNGKey(0)
    keys = jax.random.split(key, 4)
    # primary case (matches the module's expected small logits, softmax over dim=-1)
    _check(keys[0], (2, 4, 16, 16), jnp.float32)
    # ragged row count -> padded + masked tail
    _check(keys[1], (3, 5, 7, 16), jnp.float32)
    # larger bf16 case -> multi-block pipeline + dual-TensorCore partial sums
    _check(keys[2], (16, 32, 128, 16), jnp.bfloat16)
    # class dim that cannot be lane-packed -> general fallback path
    _check(keys[3], (2, 4, 16, 150), jnp.float32)
    print("KERNEL_OK")
</pallas_src>

<mosaic_0001>
module attributes {stable_mosaic.version = 11 : i64} {
  func.func @_sce_kernel(%arg0: i32, %arg1: i32, %arg2: memref<16x128xf32, #tpu.memory_space<vmem>>, %arg3: memref<16x128xf32, #tpu.memory_space<vmem>>, %arg4: memref<128x8xbf16, #tpu.memory_space<vmem>>, %arg5: memref<1x1x1xf32, #tpu.memory_space<vmem>>, %arg6: memref<1x8xf32, #tpu.memory_space<vmem>>) attributes {dimension_semantics = [#tpu.dimension_semantics<parallel>, #tpu.dimension_semantics<arbitrary>], iteration_bounds = array<i64: 1, 1>, scalar_prefetch = 0 : i64, scratch_operands = 1 : i64, tpu.core_type = #tpu.core_type<tc>, window_params = [{transform_indices = @transform_0, window_bounds = array<i64: 16, 128>}, {transform_indices = @transform_1, window_bounds = array<i64: 16, 128>}, {pipeline_mode = #tpu.pipeline_mode<synchronous>, transform_indices = @transform_2, window_bounds = array<i64: 128, 8>}, {transform_indices = @transform_3, window_bounds = array<i64: 1, 1, 1>}]} {
    %c0_i32 = arith.constant 0 : i32
    %0 = arith.cmpi eq, %arg1, %c0_i32 : i32
    %1 = arith.extui %0 : i1 to i32
    %c0_i32_0 = arith.constant 0 : i32
    %2 = arith.cmpi ne, %1, %c0_i32_0 : i32
    scf.if %2 {
      %cst_48 = arith.constant 0.000000e+00 : f32
      %142 = vector.broadcast %cst_48 : f32 to vector<1x8xf32>
      %c0_49 = arith.constant 0 : index
      %c0_50 = arith.constant 0 : index
      %143 = vector.load %arg6[%c0_49, %c0_50] : memref<1x8xf32, #tpu.memory_space<vmem>>, vector<1x8xf32>
      tpu.vector_store %arg6[%c0_49, %c0_50], %142 {strides = array<i32>} : memref<1x8xf32, #tpu.memory_space<vmem>>, vector<1x8xf32>,
    } else {
    }
    %c0 = arith.constant 0 : index
    %c0_1 = arith.constant 0 : index
    %3 = vector.load %arg2[%c0, %c0_1] : memref<16x128xf32, #tpu.memory_space<vmem>>, vector<16x128xf32>
    %c0_2 = arith.constant 0 : index
    %c0_3 = arith.constant 0 : index
    %4 = vector.load %arg3[%c0_2, %c0_3] : memref<16x128xf32, #tpu.memory_space<vmem>>, vector<16x128xf32>
    %5 = tpu.iota {dimensions = array<i32: 1>} : vector<16x128xi32>
    %c127_i32 = arith.constant 127 : i32
    %6 = tpu.dynamic_rotate %3 by %c127_i32 dim 1 : vector<16x128xf32>, i32 -> vector<16x128xf32>
    %c1_i32 = arith.constant 1 : i32
    %7 = tpu.dynamic_rotate %3 by %c1_i32 dim 1 : vector<16x128xf32>, i32 -> vector<16x128xf32>
    %c1_i32_4 = arith.constant 1 : i32
    %8 = vector.broadcast %c1_i32_4 : i32 to vector<16x128xi32>
    %9 = arith.andi %5, %8 : vector<16x128xi32>
    %c0_i32_5 = arith.constant 0 : i32
    %10 = vector.broadcast %c0_i32_5 : i32 to vector<16x128xi32>
    %11 = arith.cmpi eq, %9, %10 : vector<16x128xi32>
    %12 = arith.select %11, %6, %7 : vector<16x128xi1>, vector<16x128xf32>
    %13 = arith.maximumf %3, %12 : vector<16x128xf32>
    %c126_i32 = arith.constant 126 : i32
    %14 = tpu.dynamic_rotate %13 by %c126_i32 dim 1 : vector<16x128xf32>, i32 -> vector<16x128xf32>
    %c2_i32 = arith.constant 2 : i32
    %15 = tpu.dynamic_rotate %13 by %c2_i32 dim 1 : vector<16x128xf32>, i32 -> vector<16x128xf32>
    %c2_i32_6 = arith.constant 2 : i32
    %16 = vector.broadcast %c2_i32_6 : i32 to vector<16x128xi32>
    %17 = arith.andi %5, %16 : vector<16x128xi32>
    %c0_i32_7 = arith.constant 0 : i32
    %18 = vector.broadcast %c0_i32_7 : i32 to vector<16x128xi32>
    %19 = arith.cmpi eq, %17, %18 : vector<16x128xi32>
    %20 = arith.select %19, %14, %15 : vector<16x128xi1>, vector<16x128xf32>
    %21 = arith.maximumf %13, %20 : vector<16x128xf32>
    %c124_i32 = arith.constant 124 : i32
    %22 = tpu.dynamic_rotate %21 by %c124_i32 dim 1 : vector<16x128xf32>, i32 -> vector<16x128xf32>
    %c4_i32 = arith.constant 4 : i32
    %23 = tpu.dynamic_rotate %21 by %c4_i32 dim 1 : vector<16x128xf32>, i32 -> vector<16x128xf32>
    %c4_i32_8 = arith.constant 4 : i32
    %24 = vector.broadcast %c4_i32_8 : i32 to vector<16x128xi32>
    %25 = arith.andi %5, %24 : vector<16x128xi32>
    %c0_i32_9 = arith.constant 0 : i32
    %26 = vector.broadcast %c0_i32_9 : i32 to vector<16x128xi32>
    %27 = arith.cmpi eq, %25, %26 : vector<16x128xi32>
    %28 = arith.select %27, %22, %23 : vector<16x128xi1>, vector<16x128xf32>
    %29 = arith.maximumf %21, %28 : vector<16x128xf32>
    %c120_i32 = arith.constant 120 : i32
    %30 = tpu.dynamic_rotate %29 by %c120_i32 dim 1 : vector<16x128xf32>, i32 -> vector<16x128xf32>
    %c8_i32 = arith.constant 8 : i32
    %31 = tpu.dynamic_rotate %29 by %c8_i32 dim 1 : vector<16x128xf32>, i32 -> vector<16x128xf32>
    %c8_i32_10 = arith.constant 8 : i32
    %32 = vector.broadcast %c8_i32_10 : i32 to vector<16x128xi32>
    %33 = arith.andi %5, %32 : vector<16x128xi32>
    %c0_i32_11 = arith.constant 0 : i32
    %34 = vector.broadcast %c0_i32_11 : i32 to vector<16x128xi32>
    %35 = arith.cmpi eq, %33, %34 : vector<16x128xi32>
    %36 = arith.select %35, %30, %31 : vector<16x128xi1>, vector<16x128xf32>
    %37 = arith.maximumf %29, %36 : vector<16x128xf32>
    %c127_i32_12 = arith.constant 127 : i32
    %38 = tpu.dynamic_rotate %4 by %c127_i32_12 dim 1 : vector<16x128xf32>, i32 -> vector<16x128xf32>
    %c1_i32_13 = arith.constant 1 : i32
    %39 = tpu.dynamic_rotate %4 by %c1_i32_13 dim 1 : vector<16x128xf32>, i32 -> vector<16x128xf32>
    %c1_i32_14 = arith.constant 1 : i32
    %40 = vector.broadcast %c1_i32_14 : i32 to vector<16x128xi32>
    %41 = arith.andi %5, %40 : vector<16x128xi32>
    %c0_i32_15 = arith.constant 0 : i32
    %42 = vector.broadcast %c0_i32_15 : i32 to vector<16x128xi32>
    %43 = arith.cmpi eq, %41, %42 : vector<16x128xi32>
    %44 = arith.select %43, %38, %39 : vector<16x128xi1>, vector<16x128xf32>
    %45 = arith.maximumf %4, %44 : vector<16x128xf32>
    %c126_i32_16 = arith.constant 126 : i32
    %46 = tpu.dynamic_rotate %45 by %c126_i32_16 dim 1 : vector<16x128xf32>, i32 -> vector<16x128xf32>
    %c2_i32_17 = arith.constant 2 : i32
    %47 = tpu.dynamic_rotate %45 by %c2_i32_17 dim 1 : vector<16x128xf32>, i32 -> vector<16x128xf32>
    %c2_i32_18 = arith.constant 2 : i32
    %48 = vector.broadcast %c2_i32_18 : i32 to vector<16x128xi32>
    %49 = arith.andi %5, %48 : vector<16x128xi32>
    %c0_i32_19 = arith.constant 0 : i32
    %50 = vector.broadcast %c0_i32_19 : i32 to vector<16x128xi32>
    %51 = arith.cmpi eq, %49, %50 : vector<16x128xi32>
    %52 = arith.select %51, %46, %47 : vector<16x128xi1>, vector<16x128xf32>
    %53 = arith.maximumf %45, %52 : vector<16x128xf32>
    %c124_i32_20 = arith.constant 124 : i32
    %54 = tpu.dynamic_rotate %53 by %c124_i32_20 dim 1 : vector<16x128xf32>, i32 -> vector<16x128xf32>
    %c4_i32_21 = arith.constant 4 : i32
    %55 = tpu.dynamic_rotate %53 by %c4_i32_21 dim 1 : vector<16x128xf32>, i32 -> vector<16x128xf32>
    %c4_i32_22 = arith.constant 4 : i32
    %56 = vector.broadcast %c4_i32_22 : i32 to vector<16x128xi32>
    %57 = arith.andi %5, %56 : vector<16x128xi32>
    %c0_i32_23 = arith.constant 0 : i32
    %58 = vector.broadcast %c0_i32_23 : i32 to vector<16x128xi32>
    %59 = arith.cmpi eq, %57, %58 : vector<16x128xi32>
    %60 = arith.select %59, %54, %55 : vector<16x128xi1>, vector<16x128xf32>
    %61 = arith.maximumf %53, %60 : vector<16x128xf32>
    %c120_i32_24 = arith.constant 120 : i32
    %62 = tpu.dynamic_rotate %61 by %c120_i32_24 dim 1 : vector<16x128xf32>, i32 -> vector<16x128xf32>
    %c8_i32_25 = arith.constant 8 : i32
    %63 = tpu.dynamic_rotate %61 by %c8_i32_25 dim 1 : vector<16x128xf32>, i32 -> vector<16x128xf32>
    %c8_i32_26 = arith.constant 8 : i32
    %64 = vector.broadcast %c8_i32_26 : i32 to vector<16x128xi32>
    %65 = arith.andi %5, %64 : vector<16x128xi32>
    %c0_i32_27 = arith.constant 0 : i32
    %66 = vector.broadcast %c0_i32_27 : i32 to vector<16x128xi32>
    %67 = arith.cmpi eq, %65, %66 : vector<16x128xi32>
    %68 = arith.select %67, %62, %63 : vector<16x128xi1>, vector<16x128xf32>
    %69 = arith.maximumf %61, %68 : vector<16x128xf32>
    %70 = arith.subf %3, %37 : vector<16x128xf32>
    %71 = arith.subf %4, %69 : vector<16x128xf32>
    %72 = math.exp %70 : vector<16x128xf32>
    %73 = math.exp %71 : vector<16x128xf32>
    %c0_28 = arith.constant 0 : index
    %c0_29 = arith.constant 0 : index
    %74 = vector.load %arg4[%c0_28, %c0_29] : memref<128x8xbf16, #tpu.memory_space<vmem>>, vector<128x8xbf16>
    %75 = arith.truncf %72 : vector<16x128xf32> to vector<16x128xbf16>
    %76 = arith.extf %75 : vector<16x128xbf16> to vector<16x128xf32>
    %77 = arith.subf %72, %76 : vector<16x128xf32>
    %cst = arith.constant dense<0.000000e+00> : vector<16x8xf32>
    %78 = tpu.matmul %75, %74, %cst {dimension_numbers = #tpu.dot_dimension_numbers<[1], [0], [0], [1], [0, 0, 1, 1], [], []>} : vector<16x128xbf16>, vector<128x8xbf16>, vector<16x8xf32> -> vector<16x8xf32>
    %79 = arith.truncf %77 : vector<16x128xf32> to vector<16x128xbf16>
    %80 = arith.extf %79 : vector<16x128xbf16> to vector<16x128xf32>
    %81 = arith.subf %77, %80 : vector<16x128xf32>
    %cst_30 = arith.constant dense<0.000000e+00> : vector<16x8xf32>
    %82 = tpu.matmul %79, %74, %cst_30 {dimension_numbers = #tpu.dot_dimension_numbers<[1], [0], [0], [1], [0, 0, 1, 1], [], []>} : vector<16x128xbf16>, vector<128x8xbf16>, vector<16x8xf32> -> vector<16x8xf32>
    %83 = arith.addf %78, %82 : vector<16x8xf32>
    %84 = arith.truncf %81 : vector<16x128xf32> to vector<16x128xbf16>
    %cst_31 = arith.constant dense<0.000000e+00> : vector<16x8xf32>
    %85 = tpu.matmul %84, %74, %cst_31 {dimension_numbers = #tpu.dot_dimension_numbers<[1], [0], [0], [1], [0, 0, 1, 1], [], []>} : vector<16x128xbf16>, vector<128x8xbf16>, vector<16x8xf32> -> vector<16x8xf32>
    %86 = arith.addf %83, %85 : vector<16x8xf32>
    %87 = arith.truncf %73 : vector<16x128xf32> to vector<16x128xbf16>
    %88 = arith.extf %87 : vector<16x128xbf16> to vector<16x128xf32>
    %89 = arith.subf %73, %88 : vector<16x128xf32>
    %cst_32 = arith.constant dense<0.000000e+00> : vector<16x8xf32>
    %90 = tpu.matmul %87, %74, %cst_32 {dimension_numbers = #tpu.dot_dimension_numbers<[1], [0], [0], [1], [0, 0, 1, 1], [], []>} : vector<16x128xbf16>, vector<128x8xbf16>, vector<16x8xf32> -> vector<16x8xf32>
    %91 = arith.truncf %89 : vector<16x128xf32> to vector<16x128xbf16>
    %92 = arith.extf %91 : vector<16x128xbf16> to vector<16x128xf32>
    %93 = arith.subf %89, %92 : vector<16x128xf32>
    %cst_33 = arith.constant dense<0.000000e+00> : vector<16x8xf32>
    %94 = tpu.matmul %91, %74, %cst_33 {dimension_numbers = #tpu.dot_dimension_numbers<[1], [0], [0], [1], [0, 0, 1, 1], [], []>} : vector<16x128xbf16>, vector<128x8xbf16>, vector<16x8xf32> -> vector<16x8xf32>
    %95 = arith.addf %90, %94 : vector<16x8xf32>
    %96 = arith.truncf %93 : vector<16x128xf32> to vector<16x128xbf16>
    %cst_34 = arith.constant dense<0.000000e+00> : vector<16x8xf32>
    %97 = tpu.matmul %96, %74, %cst_34 {dimension_numbers = #tpu.dot_dimension_numbers<[1], [0], [0], [1], [0, 0, 1, 1], [], []>} : vector<16x128xbf16>, vector<128x8xbf16>, vector<16x8xf32> -> vector<16x8xf32>
    %98 = arith.addf %95, %97 : vector<16x8xf32>
    %99 = arith.mulf %72, %71 : vector<16x128xf32>
    %100 = arith.truncf %99 : vector<16x128xf32> to vector<16x128xbf16>
    %101 = arith.extf %100 : vector<16x128xbf16> to vector<16x128xf32>
    %102 = arith.subf %99, %101 : vector<16x128xf32>
    %cst_35 = arith.constant dense<0.000000e+00> : vector<16x8xf32>
    %103 = tpu.matmul %100, %74, %cst_35 {dimension_numbers = #tpu.dot_dimension_numbers<[1], [0], [0], [1], [0, 0, 1, 1], [], []>} : vector<16x128xbf16>, vector<128x8xbf16>, vector<16x8xf32> -> vector<16x8xf32>
    %104 = arith.truncf %102 : vector<16x128xf32> to vector<16x128xbf16>
    %105 = arith.extf %104 : vector<16x128xbf16> to vector<16x128xf32>
    %106 = arith.subf %102, %105 : vector<16x128xf32>
    %cst_36 = arith.constant dense<0.000000e+00> : vector<16x8xf32>
    %107 = tpu.matmul %104, %74, %cst_36 {dimension_numbers = #tpu.dot_dimension_numbers<[1], [0], [0], [1], [0, 0, 1, 1], [], []>} : vector<16x128xbf16>, vector<128x8xbf16>, vector<16x8xf32> -> vector<16x8xf32>
    %108 = arith.addf %103, %107 : vector<16x8xf32>
    %109 = arith.truncf %106 : vector<16x128xf32> to vector<16x128xbf16>
    %cst_37 = arith.constant dense<0.000000e+00> : vector<16x8xf32>
    %110 = tpu.matmul %109, %74, %cst_37 {dimension_numbers = #tpu.dot_dimension_numbers<[1], [0], [0], [1], [0, 0, 1, 1], [], []>} : vector<16x128xbf16>, vector<128x8xbf16>, vector<16x8xf32> -> vector<16x8xf32>
    %111 = arith.addf %108, %110 : vector<16x8xf32>
    %112 = arith.mulf %73, %70 : vector<16x128xf32>
    %113 = arith.truncf %112 : vector<16x128xf32> to vector<16x128xbf16>
    %114 = arith.extf %113 : vector<16x128xbf16> to vector<16x128xf32>
    %115 = arith.subf %112, %114 : vector<16x128xf32>
    %cst_38 = arith.constant dense<0.000000e+00> : vector<16x8xf32>
    %116 = tpu.matmul %113, %74, %cst_38 {dimension_numbers = #tpu.dot_dimension_numbers<[1], [0], [0], [1], [0, 0, 1, 1], [], []>} : vector<16x128xbf16>, vector<128x8xbf16>, vector<16x8xf32> -> vector<16x8xf32>
    %117 = arith.truncf %115 : vector<16x128xf32> to vector<16x128xbf16>
    %118 = arith.extf %117 : vector<16x128xbf16> to vector<16x128xf32>
    %119 = arith.subf %115, %118 : vector<16x128xf32>
    %cst_39 = arith.constant dense<0.000000e+00> : vector<16x8xf32>
    %120 = tpu.matmul %117, %74, %cst_39 {dimension_numbers = #tpu.dot_dimension_numbers<[1], [0], [0], [1], [0, 0, 1, 1], [], []>} : vector<16x128xbf16>, vector<128x8xbf16>, vector<16x8xf32> -> vector<16x8xf32>
    %121 = arith.addf %116, %120 : vector<16x8xf32>
    %122 = arith.truncf %119 : vector<16x128xf32> to vector<16x128xbf16>
    %cst_40 = arith.constant dense<0.000000e+00> : vector<16x8xf32>
    %123 = tpu.matmul %122, %74, %cst_40 {dimension_numbers = #tpu.dot_dimension_numbers<[1], [0], [0], [1], [0, 0, 1, 1], [], []>} : vector<16x128xbf16>, vector<128x8xbf16>, vector<16x8xf32> -> vector<16x8xf32>
    %124 = arith.addf %121, %123 : vector<16x8xf32>
    %125 = tpu.reciprocal %86 : vector<16x8xf32> -> vector<16x8xf32>
    %126 = arith.mulf %111, %125 : vector<16x8xf32>
    %127 = tpu.reciprocal %98 : vector<16x8xf32> -> vector<16x8xf32>
    %128 = arith.mulf %124, %127 : vector<16x8xf32>
    %129 = arith.addf %126, %128 : vector<16x8xf32>
    %130 = math.log %86 : vector<16x8xf32>
    %131 = arith.subf %129, %130 : vector<16x8xf32>
    %132 = math.log %98 : vector<16x8xf32>
    %133 = arith.subf %131, %132 : vector<16x8xf32>
    %c0_41 = arith.constant 0 : index
    %c0_42 = arith.constant 0 : index
    %134 = vector.load %arg6[%c0_41, %c0_42] : memref<1x8xf32, #tpu.memory_space<vmem>>, vector<1x8xf32>
    %cst_43 = arith.constant dense<0.000000e+00> : vector<8xf32>
    %135 = vector.multi_reduction <add>, %133, %cst_43 [0] : vector<16x8xf32> to vector<8xf32>
    %136 = vector.shape_cast %135 : vector<8xf32> to vector<1x8xf32>
    %137 = arith.addf %134, %136 : vector<1x8xf32>
    %c0_44 = arith.constant 0 : index
    %c0_45 = arith.constant 0 : index
    %138 = vector.load %arg6[%c0_44, %c0_45] : memref<1x8xf32, #tpu.memory_space<vmem>>, vector<1x8xf32>
    tpu.vector_store %arg6[%c0_44, %c0_45], %137 {strides = array<i32>} : memref<1x8xf32, #tpu.memory_space<vmem>>, vector<1x8xf32>,
    %c0_i32_46 = arith.constant 0 : i32
    %139 = arith.cmpi eq, %arg1, %c0_i32_46 : i32
    %140 = arith.extui %139 : i1 to i32
    %c0_i32_47 = arith.constant 0 : i32
    %141 = arith.cmpi ne, %140, %c0_i32_47 : i32
    scf.if %141 {
      %c0_48 = arith.constant 0 : index
      %c0_49 = arith.constant 0 : index
      %142 = vector.load %arg6[%c0_48, %c0_49] : memref<1x8xf32, #tpu.memory_space<vmem>>, vector<1x8xf32>
      %143 = vector.shape_cast %142 : vector<1x8xf32> to vector<1x1x8xf32>
      %cst_50 = arith.constant dense<0.000000e+00> : vector<1xf32>
      %144 = vector.multi_reduction <add>, %143, %cst_50 [1, 2] : vector<1x1x8xf32> to vector<1xf32>
      %145 = vector.shape_cast %144 : vector<1xf32> to vector<1x1x1xf32>
      %146 = vector.extract %145[0, 0, 0] : f32 from vector<1x1x1xf32>
      %147 = vector.broadcast %146 : f32 to vector<1x1xf32>
      %cst_51 = arith.constant -2.44140625E-4 : f32
      %148 = vector.broadcast %cst_51 : f32 to vector<1x1xf32>
      %149 = arith.mulf %147, %148 : vector<1x1xf32>
      %150 = vector.shape_cast %149 : vector<1x1xf32> to vector<1x1x1xf32>
      %c0_52 = arith.constant 0 : index
      %c0_53 = arith.constant 0 : index
      %c0_54 = arith.constant 0 : index
      %151 = vector.load %arg5[%c0_52, %c0_53, %c0_54] : memref<1x1x1xf32, #tpu.memory_space<vmem>>, vector<1x1x1xf32>
      tpu.vector_store %arg5[%c0_52, %c0_53, %c0_54], %150 {strides = array<i32>} : memref<1x1x1xf32, #tpu.memory_space<vmem>>, vector<1x1x1xf32>,
    } else {
    }
    return
  }
  func.func @transform_0(%arg0: i32, %arg1: i32) -> (i32, i32) {
    %c1_i32 = arith.constant 1 : i32
    %0 = arith.muli %arg0, %c1_i32 : i32
    %1 = arith.addi %0, %arg1 : i32
    %c0_i32 = arith.constant 0 : i32
    %c0_i32_0 = arith.constant 0 : i32
    return %1, %c0_i32 : i32, i32
  }
  func.func @transform_1(%arg0: i32, %arg1: i32) -> (i32, i32) {
    %c1_i32 = arith.constant 1 : i32
    %0 = arith.muli %arg0, %c1_i32 : i32
    %1 = arith.addi %0, %arg1 : i32
    %c0_i32 = arith.constant 0 : i32
    %c0_i32_0 = arith.constant 0 : i32
    return %1, %c0_i32 : i32, i32
  }
  func.func @transform_2(%arg0: i32, %arg1: i32) -> (i32, i32) {
    %c0_i32 = arith.constant 0 : i32
    %c0_i32_0 = arith.constant 0 : i32
    %c0_i32_1 = arith.constant 0 : i32
    return %c0_i32, %c0_i32_0 : i32, i32
  }
  func.func @transform_3(%arg0: i32, %arg1: i32) -> (i32, i32, i32) {
    %c0_i32 = arith.constant 0 : i32
    %c0_i32_0 = arith.constant 0 : i32
    %c0_i32_1 = arith.constant 0 : i32
    return %arg0, %c0_i32, %c0_i32_0 : i32, i32, i32
  }
}

</mosaic_0001>

<bundles_post_ra>
// kernel: tpu_custom_call.1
= control target key start
LH: loop header
LB: loop body
LE: loop exit
PB: predicated region body
PF: predicated region fallthrough
CT: control target
= control target key end

     0   :  { %s1303_s14 = smov 1   ;;  %s1304_s15 = smov 127   ;;  %s1743_s0 = inlined_call_operand.vmem [shape: f32[16,128], index: 0, kind: input, shape index: {}]   ;;  %s1744_s1 = inlined_call_operand.vmem [shape: f32[16,128], index: 1, kind: input, shape index: {}]   ;;  %s1745_s2 = inlined_call_operand.vmem [shape: bf16[128,8], index: 2, kind: input, shape index: {}]   ;;  %s1746_s3 = inlined_call_operand.hbm [shape: f32[1,1,1], index: 3, kind: output, shape index: {}]  }
   0x1   :  { %v1337_v0 = vld [vmem:[%s1743_s0] sm:$0xff]  ;;  %v1344_v1 = vld [vmem:[%s1743_s0 + $0x8] sm:$0xff] }
   0x2   :  { %76 = vrot.lane.b32.xlu1 %v1337_v0, %s1303_s14  ;;  %72 = vrot.lane.b32.xlu0 %v1337_v0, %s1304_s15  ;;  %v1349_v2 = vld [vmem:[%s1744_s1 + $0x8] sm:$0xff]  ;;  %v1356_v3 = vld [vmem:[%s1744_s1] sm:$0xff] }
   0x6   :  { %78 = vrot.lane.b32.xlu1 %v1344_v1, %s1303_s14  ;;  %74 = vrot.lane.b32.xlu0 %v1344_v1, %s1304_s15 }
   0x7   :  { %8 = vsyncpa [#allocation4], 0  ;;  %v70_v4 = vlaneseq  ;;  %s1305_s0 = smov 126   ;;  %s1306_s1 = smov 2   ;;  %v1309_v42 = vmov 0.0   ;;  %v1399_v43 = vld [vmem:[%s1745_s2 + $0x38] sm:$0xff]  }
   0x8   :  { %s1307_s22 = smov 124   ;;  %s1308_s23 = smov 4   ;;  %1016 = vmatprep.subr.bf16.mxu1 %v1309_v42  ;;  %996 = vmatprep.subr.bf16.mxu0 %v1309_v42  ;;  %v1408_v44 = vld [vmem:[%s1745_s2 + $0x30] sm:$0xff]   ;;  %v1418_v47 = vld [vmem:[%s1745_s2 + $0x28] sm:$0xff]   ;;  %v1431_v51 = vld [vmem:[%s1745_s2 + $0x20] sm:$0xff]   ;;  %vm1312_vm3 = vmmov 0  }
   0x9   :  { %v1362_v5 = vand.u32 127, %v70_v4  ;;  %1017 = vmatpush3.bf16.msra.mxu1 %v1399_v43  ;;  %997 = vmatpush3.bf16.msra.mxu0 %v1399_v43  ;;  %s1310_s5 = smov 120   ;;  %v1444_v56 = vld [vmem:[%s1745_s2 + $0x18] sm:$0xff]   ;;  %s1311_s8 = smov 8   ;;  %v1452_v60 = vld [vmem:[%s1745_s2 + $0x10] sm:$0xff]   ;;  %vm64_vm5 = vcmask 57344  }
   0xa   :  { %130 = vrot.lane.b32.xlu1 %v1349_v2, %s1304_s15  ;;  %128 = vrot.lane.b32.xlu0 %v1356_v3, %s1304_s15  ;;  %65 = vst.msk [vmem:[#allocation2] sm:$0x1] %vm64_vm5, %v1309_v42  ;;  %vm823_vm6 = vcmask 64512   ;;  %vm852_vm7 = vcmask 0  }
   0xb   :  { %v80_v6 = vand.u32 1, %v1362_v5  ;;  %v94_v24 = vand.u32 2, %v1362_v5  ;;  %1018 = vmatprep.subr.bf16.mxu1 %v1309_v42  ;;  %998 = vmatprep.subr.bf16.mxu0 %v1309_v42  ;;  %v108_v45 = vand.u32 4, %v1362_v5 }
   0xc   :  { %1032 = vmatprep.mubr.msk.bf16.mxu1 %vm1312_vm3, %v1309_v42  ;;  %1012 = vmatprep.mubr.msk.bf16.mxu0 %vm1312_vm3, %v1309_v42 }
   0xd   :  { %vm1365_vm0 = vcmp.eq.s32.totalorder %v80_v6, 0  ;;  %vm1382_vm1 = vcmp.eq.s32.totalorder %v94_v24, 0  ;;  %1019 = vmatpush3.bf16.msra.mxu1 %v1408_v44  ;;  %999 = vmatpush3.bf16.msra.mxu0 %v1408_v44  ;;  %vm1420_vm2 = vcmp.eq.s32.totalorder %v108_v45, 0  ;;  %v1465_v6 = vld [vmem:[%s1745_s2 + $0x8] sm:$0xff]  }
   0xe   :  { %134 = vrot.lane.b32.xlu1 %v1349_v2, %s1303_s14  ;;  %132 = vrot.lane.b32.xlu0 %v1356_v3, %s1303_s14 }
   0xf   :  { %1020 = vmatprep.subr.bf16.mxu1 %v1309_v42  ;;  %1000 = vmatprep.subr.bf16.mxu0 %v1309_v42 }
  0x11   :  { %1021 = vmatpush3.bf16.msra.mxu1 %v1418_v47  ;;  %1001 = vmatpush3.bf16.msra.mxu0 %v1418_v47 }
  0x12   :  { %1022 = vmatprep.subr.bf16.mxu1 %v1309_v42  ;;  %1002 = vmatprep.subr.bf16.mxu0 %v1309_v42 }
  0x15   :  { %1023 = vmatpush3.bf16.msra.mxu1 %v1431_v51  ;;  %1003 = vmatpush3.bf16.msra.mxu0 %v1431_v51 }
  0x16   :  { %1024 = vmatprep.subr.bf16.mxu1 %v1309_v42  ;;  %1004 = vmatprep.subr.bf16.mxu0 %v1309_v42 }
  0x19   :  { %1025 = vmatpush3.bf16.msra.mxu1 %v1444_v56  ;;  %1005 = vmatpush3.bf16.msra.mxu0 %v1444_v56 }
  0x1a   :  { %1026 = vmatprep.subr.bf16.mxu1 %v1309_v42  ;;  %1006 = vmatprep.subr.bf16.mxu0 %v1309_v42 }
  0x1d   :  { %1027 = vmatpush3.bf16.msra.mxu1 %v1452_v60  ;;  %1007 = vmatpush3.bf16.msra.mxu0 %v1452_v60 }
  0x1e   :  { %1028 = vmatprep.subr.bf16.mxu1 %v1309_v42  ;;  %1008 = vmatprep.subr.bf16.mxu0 %v1309_v42 }
  0x21   :  { %1029 = vmatpush3.bf16.msra.mxu1 %v1465_v6  ;;  %1009 = vmatpush3.bf16.msra.mxu0 %v1465_v6 }
  0x22   :  { %1030 = vmatprep.subr.bf16.mxu1 %v1309_v42  ;;  %1010 = vmatprep.subr.bf16.mxu0 %v1309_v42 }
  0x74   :  { %v77_v8 = vpop.permute.xlu1 %76  ;;  %v73_v9 = vpop.permute.xlu0 %72 }
  0x75   :  { %v82_v10 = vsel %vm1365_vm0, %v73_v9, %v77_v8  ;;  %v1474_v9 = vld [vmem:[%s1745_s2] sm:$0xff]   ;;  %s1313_s2 = smov [#allocation3]  }
  0x76   :  { %v84_v11 = vmax.f32 %v1337_v0, %v82_v10  ;;  %1031 = vmatpush3.bf16.msra.mxu1 %v1474_v9  ;;  %1011 = vmatpush3.bf16.msra.mxu0 %v1474_v9  ;;  %v122_v10 = vand.u32 8, %v1362_v5  ;;  %s860_s15 = sshll.u32 %s1313_s2, 4  ;;  %s861_s15 = int_to_ptr.vmem [resolvable:$true] %s860_s15 }
  0x77   :  { %1056 = vmatprep.subr.bf16.mxu1 %v1309_v42  ;;  %1036 = vmatprep.subr.bf16.mxu0 %v1309_v42  ;;  %s1281_s17 = scalar_lea.vmem %s861_s15, 16  ;;  %s1285_s18 = scalar_lea.vmem %s861_s15, 32 }
  0x78   :  { %v79_v12 = vpop.permute.xlu1 %78  ;;  %86 = vrot.lane.b32.xlu0 %v84_v11, %s1305_s0  ;;  %v75_v13 = vpop.permute.xlu0 %74  ;;  %vm1486_vm4 = vcmp.eq.s32.totalorder %v122_v10, 0  ;;  %p1282_p0 = scmp.ne.s32.totalorder %s861_s15, %s1281_s17  ;;  %p1286_p1 = scmp.lt.s32.totalorder %s861_s15, %s861_s15 }
  0x79   :  { %v83_v14 = vsel %vm1365_vm0, %v75_v13, %v79_v12  ;;  %p1287_p2 = scmp.lt.s32.totalorder %s1285_s18, %s1281_s17 }
  0x7a   :  { %v85_v15 = vmax.f32 %v1344_v1, %v83_v14 }
  0x7b   :  { %p1288_p3 = por %p1287_p2, %p1286_p1 }
  0x7c   :  { %v131_v16 = vpop.permute.xlu1 %130  ;;  %90 = vrot.lane.b32.xlu0 %v84_v11, %s1306_s1  ;;  %88 = vrot.lane.b32.xlu1 %v85_v15, %s1305_s0  ;;  %v129_v17 = vpop.permute.xlu0 %128 }
  0x7d   :  { %p1289_p4 = pnand %p1288_p3, %p1282_p0 }
  0x80   :  { %v135_v18 = vpop.permute.xlu1 %134  ;;  %92 = vrot.lane.b32.xlu1 %v85_v15, %s1306_s1  ;;  %v133_v19 = vpop.permute.xlu0 %132 }
  0x81   :  { %v137_v20 = vsel %vm1365_vm0, %v131_v16, %v135_v18  ;;  %v136_v21 = vsel %vm1365_vm0, %v129_v17, %v133_v19 }
  0x82   :  { %v139_v22 = vmax.f32 %v1349_v2, %v137_v20  ;;  %v138_v23 = vmax.f32 %v1356_v3, %v136_v21 }
  0x84   :  { %142 = vrot.lane.b32.xlu1 %v139_v22, %s1305_s0  ;;  %140 = vrot.lane.b32.xlu0 %v138_v23, %s1305_s0 }
  0x88   :  { %146 = vrot.lane.b32.xlu1 %v139_v22, %s1306_s1  ;;  %144 = vrot.lane.b32.xlu0 %v138_v23, %s1306_s1 }
  0xea   :  { %v87_v25 = vpop.permute.xlu0 %86 }
  0xee   :  { %v89_v27 = vpop.permute.xlu1 %88  ;;  %v91_v28 = vpop.permute.xlu0 %90 }
  0xef   :  { %v96_v29 = vsel %vm1382_vm1, %v87_v25, %v91_v28 }
  0xf0   :  { %v98_v30 = vmax.f32 %v84_v11, %v96_v29 }
  0xf2   :  { %v93_v31 = vpop.permute.xlu1 %92  ;;  %100 = vrot.lane.b32.xlu0 %v98_v30, %s1307_s22 }
  0xf3   :  { %v97_v32 = vsel %vm1382_vm1, %v89_v27, %v93_v31 }
  0xf4   :  { %v99_v33 = vmax.f32 %v85_v15, %v97_v32 }
  0xf6   :  { %102 = vrot.lane.b32.xlu1 %v99_v33, %s1307_s22  ;;  %v143_v34 = vpop.permute.xlu1 %142  ;;  %104 = vrot.lane.b32.xlu0 %v98_v30, %s1308_s23  ;;  %v141_v35 = vpop.permute.xlu0 %140 }
  0xfa   :  { %106 = vrot.lane.b32.xlu1 %v99_v33, %s1308_s23  ;;  %v147_v36 = vpop.permute.xlu1 %146  ;;  %v145_v37 = vpop.permute.xlu0 %144 }
  0xfb   :  { %v149_v38 = vsel %vm1382_vm1, %v143_v34, %v147_v36  ;;  %v148_v39 = vsel %vm1382_vm1, %v141_v35, %v145_v37 }
  0xfc   :  { %v151_v40 = vmax.f32 %v139_v22, %v149_v38  ;;  %v150_v41 = vmax.f32 %v138_v23, %v148_v39 }
  0xfe   :  { %154 = vrot.lane.b32.xlu1 %v151_v40, %s1307_s22  ;;  %152 = vrot.lane.b32.xlu0 %v150_v41, %s1307_s22 }
 0x102   :  { %158 = vrot.lane.b32.xlu1 %v151_v40, %s1308_s23  ;;  %156 = vrot.lane.b32.xlu0 %v150_v41, %s1308_s23 }
 0x164   :  { %v101_v46 = vpop.permute.xlu0 %100 }
 0x168   :  { %v103_v49 = vpop.permute.xlu1 %102  ;;  %v105_v50 = vpop.permute.xlu0 %104 }
 0x169   :  { %v110_v52 = vsel %vm1420_vm2, %v101_v46, %v105_v50 }
 0x16a   :  { %v112_v53 = vmax.f32 %v98_v30, %v110_v52 }
 0x16c   :  { %v107_v54 = vpop.permute.xlu1 %106  ;;  %114 = vrot.lane.b32.xlu0 %v112_v53, %s1310_s5 }
 0x16d   :  { %v111_v55 = vsel %vm1420_vm2, %v103_v49, %v107_v54 }
 0x16e   :  { %v113_v57 = vmax.f32 %v99_v33, %v111_v55 }
 0x170   :  { %116 = vrot.lane.b32.xlu1 %v113_v57, %s1310_s5  ;;  %v155_v58 = vpop.permute.xlu1 %154  ;;  %118 = vrot.lane.b32.xlu0 %v112_v53, %s1311_s8  ;;  %v153_v59 = vpop.permute.xlu0 %152 }
 0x174   :  { %120 = vrot.lane.b32.xlu1 %v113_v57, %s1311_s8  ;;  %v159_v61 = vpop.permute.xlu1 %158  ;;  %v157_v62 = vpop.permute.xlu0 %156 }
 0x175   :  { %v161_v63 = vsel %vm1420_vm2, %v155_v58, %v159_v61  ;;  %v160_v4 = vsel %vm1420_vm2, %v153_v59, %v157_v62 }
 0x176   :  { %v163_v7 = vmax.f32 %v151_v40, %v161_v63  ;;  %v162_v8 = vmax.f32 %v150_v41, %v160_v4 }
 0x178   :  { %166 = vrot.lane.b32.xlu1 %v163_v7, %s1310_s5  ;;  %164 = vrot.lane.b32.xlu0 %v162_v8, %s1310_s5 }
 0x17c   :  { %170 = vrot.lane.b32.xlu1 %v163_v7, %s1311_s8  ;;  %168 = vrot.lane.b32.xlu0 %v162_v8, %s1311_s8 }
 0x1de   :  { %v115_v11 = vpop.permute.xlu0 %114 }
 0x1e2   :  { %v117_v13 = vpop.permute.xlu1 %116  ;;  %v119_v14 = vpop.permute.xlu0 %118 }
 0x1e3   :  { %v124_v15 = vsel %vm1486_vm4, %v115_v11, %v119_v14 }
 0x1e4   :  { %v126_v16 = vmax.f32 %v112_v53, %v124_v15 }
 0x1e6   :  { %v176_v17 = vsub.f32 %v1337_v0, %v126_v16  ;;  %v121_v18 = vpop.permute.xlu1 %120 }
 0x1e7   :  { %v125_v19 = vsel %vm1486_vm4, %v117_v13, %v121_v18 }
 0x1e8   :  { %v180_v20 = vmul.f32 1.442695, %v176_v17  ;;  %v127_v21 = vmax.f32 %v113_v57, %v125_v19 }
 0x1ea   :  { %1257 = vpow2.f32 %v180_v20  ;;  %v177_v5 = vsub.f32 %v1344_v1, %v127_v21  ;;  %v167_v22 = vpop.permute.xlu1 %166  ;;  %v165_v23 = vpop.permute.xlu0 %164 }
 0x1ec   :  { %v182_v24 = vmul.f32 1.442695, %v177_v5 }
 0x1ee   :  { %1259 = vpow2.f32 %v182_v24  ;;  %v171_v25 = vpop.permute.xlu1 %170  ;;  %v169_v26 = vpop.permute.xlu0 %168 }
 0x1ef   :  { %v173_v27 = vsel %vm1486_vm4, %v167_v22, %v171_v25  ;;  %v172_v0 = vsel %vm1486_vm4, %v165_v23, %v169_v26 }
 0x1f0   :  { %v175_v28 = vmax.f32 %v163_v7, %v173_v27  ;;  %v174_v29 = vmax.f32 %v162_v8, %v172_v0 }
 0x1f2   :  { %v179_v30 = vsub.f32 %v1349_v2, %v175_v28  ;;  %v178_v31 = vsub.f32 %v1356_v3, %v174_v29 }
 0x1f4   :  { %v186_v32 = vmul.f32 1.442695, %v179_v30  ;;  %v184_v1 = vmul.f32 1.442695, %v178_v31 }
 0x1f6   :  { %1261 = vpow2.f32 %v186_v32 }
 0x1f7   :  { %v1258_v33 = vpop.eup %1257  ;;  %1263 = vpow2.f32 %v184_v1 }
 0x1f8   :  { %v524_v34 = vmul.f32 %v1258_v33, %v178_v31 }
 0x1fb   :  { %v1260_v35 = vpop.eup %1259 }
 0x1fc   :  { %v525_v36 = vmul.f32 %v1260_v35, %v179_v30  ;;  %v204_v37 = vpack.c.bf16 %v1260_v35, %v1258_v33 }
 0x1fe   :  { %1033 = vmatmul.mubr.bf16.vlgmr.msra.gmra.mxu1 %v204_v37  ;;  %v205_v38 = vunpack.c.l.bf16 %v204_v37  ;;  %v206_v39 = vunpack.c.h.bf16 %v204_v37  ;;  %v1502_v40 = vpack.c.bf16 %v525_v36, %v524_v34 }
 0x1ff   :  { %1057 = vmatpush3.bf16.msra.mxu1 %v1399_v43  ;;  %1072 = vmatprep.mubr.msk.bf16.mxu1 %vm1312_vm3, %v1309_v42 }
 0x200   :  { %1058 = vmatprep.subr.bf16.mxu1 %v1309_v42  ;;  %v1508_v2 = vsub.f32 %v1258_v33, %v205_v38  ;;  %v1510_v3 = vsub.f32 %v1260_v35, %v206_v39  ;;  %v527_v41 = vunpack.c.l.bf16 %v1502_v40  ;;  %v528_v45 = vunpack.c.h.bf16 %v1502_v40 }
 0x202   :  { %v1516_v46 = vpack.c.bf16 %v1510_v3, %v1508_v2  ;;  %v529_v48 = vsub.f32 %v524_v34, %v527_v41  ;;  %v530_v49 = vsub.f32 %v525_v36, %v528_v45 }
 0x203   :  { %v1262_v50 = vpop.eup %1261  ;;  %1059 = vmatpush3.bf16.msra.mxu1 %v1408_v44 }
 0x204   :  { %v1264_v52 = vpop.eup %1263  ;;  %1013 = vmatmul.mubr.bf16.vlgmr.msra.gmra.mxu0 %v1516_v46  ;;  %1060 = vmatprep.subr.bf16.mxu1 %v1309_v42  ;;  %v1521_v53 = vpack.c.bf16 %v530_v49, %v529_v48  ;;  %v663_v54 = vmul.f32 %v1262_v50, %v177_v5  ;;  %v210_v5 = vunpack.c.l.bf16 %v1516_v46  ;;  %v211_v22 = vunpack.c.h.bf16 %v1516_v46 }
 0x205   :  { %1037 = vmatpush3.bf16.msra.mxu0 %v1399_v43  ;;  %1052 = vmatprep.mubr.msk.bf16.mxu0 %vm1312_vm3, %v1309_v42  ;;  %v662_v55 = vmul.f32 %v1264_v52, %v176_v17  ;;  %v1553_v14 = vpack.c.bf16 %v1262_v50, %v1264_v52 }
 0x206   :  { %1038 = vmatprep.subr.bf16.mxu0 %v1309_v42  ;;  %v532_v57 = vunpack.c.l.bf16 %v1521_v53  ;;  %v533_v58 = vunpack.c.h.bf16 %v1521_v53  ;;  %v212_v24 = vsub.f32 %v1508_v2, %v210_v5  ;;  %v213_v25 = vsub.f32 %v1510_v3, %v211_v22 }
 0x207   :  { %1061 = vmatpush3.bf16.msra.mxu1 %v1418_v47  ;;  %v1530_v59 = vpack.c.bf16 %v663_v54, %v662_v55  ;;  %v389_v18 = vunpack.c.l.bf16 %v1553_v14  ;;  %v390_v19 = vunpack.c.h.bf16 %v1553_v14 }
 0x208   :  { %1062 = vmatprep.subr.bf16.mxu1 %v1309_v42  ;;  %v1533_v61 = vsub.f32 %v529_v48, %v532_v57  ;;  %v1535_v62 = vsub.f32 %v530_v49, %v533_v58  ;;  %v344_v26 = vpack.c.bf16 %v213_v25, %v212_v24 }
 0x209   :  { %1039 = vmatpush3.bf16.msra.mxu0 %v1408_v44  ;;  %v665_v63 = vunpack.c.l.bf16 %v1530_v59  ;;  %v666_v4 = vunpack.c.h.bf16 %v1530_v59  ;;  %v391_v20 = vsub.f32 %v1264_v52, %v389_v18  ;;  %v392_v21 = vsub.f32 %v1262_v50, %v390_v19 }
 0x20a   :  { %1040 = vmatprep.subr.bf16.mxu0 %v1309_v42  ;;  %v618_v7 = vpack.c.bf16 %v1535_v62, %v1533_v61 }
 0x20b   :  { %1063 = vmatpush3.bf16.msra.mxu1 %v1431_v51  ;;  %v667_v8 = vsub.f32 %v662_v55, %v665_v63  ;;  %v668_v10 = vsub.f32 %v663_v54, %v666_v4  ;;  %v393_v23 = vpack.c.bf16 %v392_v21, %v391_v20 }
 0x20c   :  { %1064 = vmatprep.subr.bf16.mxu1 %v1309_v42 }
 0x20d   :  { %1041 = vmatpush3.bf16.msra.mxu0 %v1418_v47  ;;  %v1546_v11 = vpack.c.bf16 %v668_v10, %v667_v8  ;;  %v394_v27 = vunpack.c.l.bf16 %v393_v23  ;;  %v395_v0 = vunpack.c.h.bf16 %v393_v23 }
 0x20e   :  { %1042 = vmatprep.subr.bf16.mxu0 %v1309_v42 }
 0x20f   :  { %1065 = vmatpush3.bf16.msra.mxu1 %v1444_v56  ;;  %v670_v12 = vunpack.c.l.bf16 %v1546_v11  ;;  %v671_v13 = vunpack.c.h.bf16 %v1546_v11  ;;  %v396_v28 = vsub.f32 %v391_v20, %v394_v27  ;;  %v397_v29 = vsub.f32 %v392_v21, %v395_v0 }
 0x210   :  { %1066 = vmatprep.subr.bf16.mxu1 %v1309_v42 }
 0x211   :  { %1043 = vmatpush3.bf16.msra.mxu0 %v1431_v51  ;;  %v1556_v15 = vsub.f32 %v667_v8, %v670_v12  ;;  %v1558_v16 = vsub.f32 %v668_v10, %v671_v13  ;;  %v480_v30 = vpack.c.bf16 %v397_v29, %v396_v28 }
 0x212   :  { %1044 = vmatprep.subr.bf16.mxu0 %v1309_v42 }
 0x213   :  { %1067 = vmatpush3.bf16.msra.mxu1 %v1452_v60  ;;  %v756_v17 = vpack.c.bf16 %v1558_v16, %v1556_v15 }
 0x214   :  { %1068 = vmatprep.subr.bf16.mxu1 %v1309_v42 }
 0x215   :  { %1045 = vmatpush3.bf16.msra.mxu0 %v1444_v56 }
 0x216   :  { %1046 = vmatprep.subr.bf16.mxu0 %v1309_v42 }
 0x217   :  { %1069 = vmatpush3.bf16.msra.mxu1 %v1465_v6 }
 0x218   :  { %1070 = vmatprep.subr.bf16.mxu1 %v1309_v42 }
 0x219   :  { %1047 = vmatpush3.bf16.msra.mxu0 %v1452_v60 }
 0x21a   :  { %1048 = vmatprep.subr.bf16.mxu0 %v1309_v42 }
 0x21b   :  { %1071 = vmatpush3.bf16.msra.mxu1 %v1474_v9 }
 0x21c   :  { %1096 = vmatprep.subr.bf16.mxu1 %v1309_v42 }
 0x21d   :  { %1049 = vmatpush3.bf16.msra.mxu0 %v1465_v6 }
 0x21e   :  { %1073 = vmatmul.mubr.bf16.vlgmr.msra.gmra.mxu1 %v393_v23  ;;  %1050 = vmatprep.subr.bf16.mxu0 %v1309_v42 }
 0x21f   :  { %1097 = vmatpush3.bf16.msra.mxu1 %v1399_v43  ;;  %1112 = vmatprep.mubr.msk.bf16.mxu1 %vm1312_vm3, %v1309_v42 }
 0x220   :  { %1098 = vmatprep.subr.bf16.mxu1 %v1309_v42 }
 0x221   :  { %1051 = vmatpush3.bf16.msra.mxu0 %v1474_v9 }
 0x222   :  { %1076 = vmatprep.subr.bf16.mxu0 %v1309_v42 }
 0x223   :  { %1099 = vmatpush3.bf16.msra.mxu1 %v1408_v44 }
 0x224   :  { %1053 = vmatmul.mubr.bf16.vlgmr.msra.gmra.mxu0 %v344_v26  ;;  %1100 = vmatprep.subr.bf16.mxu1 %v1309_v42 }
 0x225   :  { %1077 = vmatpush3.bf16.msra.mxu0 %v1399_v43  ;;  %1092 = vmatprep.mubr.msk.bf16.mxu0 %vm1312_vm3, %v1309_v42 }
 0x226   :  { %1078 = vmatprep.subr.bf16.mxu0 %v1309_v42 }
 0x227   :  { %1101 = vmatpush3.bf16.msra.mxu1 %v1418_v47 }
 0x228   :  { %1102 = vmatprep.subr.bf16.mxu1 %v1309_v42 }
 0x229   :  { %1079 = vmatpush3.bf16.msra.mxu0 %v1408_v44 }
 0x22a   :  { %1080 = vmatprep.subr.bf16.mxu0 %v1309_v42 }
 0x22b   :  { %1103 = vmatpush3.bf16.msra.mxu1 %v1431_v51 }
 0x22c   :  { %1104 = vmatprep.subr.bf16.mxu1 %v1309_v42 }
 0x22d   :  { %1081 = vmatpush3.bf16.msra.mxu0 %v1418_v47 }
 0x22e   :  { %1082 = vmatprep.subr.bf16.mxu0 %v1309_v42 }
 0x22f   :  { %1105 = vmatpush3.bf16.msra.mxu1 %v1444_v56 }
 0x230   :  { %1106 = vmatprep.subr.bf16.mxu1 %v1309_v42 }
 0x231   :  { %1083 = vmatpush3.bf16.msra.mxu0 %v1431_v51 }
 0x232   :  { %1084 = vmatprep.subr.bf16.mxu0 %v1309_v42 }
 0x233   :  { %1107 = vmatpush3.bf16.msra.mxu1 %v1452_v60 }
 0x234   :  { %1108 = vmatprep.subr.bf16.mxu1 %v1309_v42 }
 0x235   :  { %1085 = vmatpush3.bf16.msra.mxu0 %v1444_v56 }
 0x236   :  { %1086 = vmatprep.subr.bf16.mxu0 %v1309_v42 }
 0x237   :  { %1109 = vmatpush3.bf16.msra.mxu1 %v1465_v6 }
 0x238   :  { %1110 = vmatprep.subr.bf16.mxu1 %v1309_v42 }
 0x239   :  { %1087 = vmatpush3.bf16.msra.mxu0 %v1452_v60 }
 0x23a   :  { %1088 = vmatprep.subr.bf16.mxu0 %v1309_v42 }
 0x23b   :  { %1111 = vmatpush3.bf16.msra.mxu1 %v1474_v9 }
 0x23c   :  { %1136 = vmatprep.subr.bf16.mxu1 %v1309_v42 }
 0x23d   :  { %1089 = vmatpush3.bf16.msra.mxu0 %v1465_v6 }
 0x23e   :  { %1113 = vmatmul.mubr.bf16.vlgmr.msra.gmra.mxu1 %v480_v30  ;;  %1090 = vmatprep.subr.bf16.mxu0 %v1309_v42 }
 0x23f   :  { %1137 = vmatpush3.bf16.msra.mxu1 %v1399_v43  ;;  %1152 = vmatprep.mubr.msk.bf16.mxu1 %vm1312_vm3, %v1309_v42 }
 0x240   :  { %1138 = vmatprep.subr.bf16.mxu1 %v1309_v42 }
 0x241   :  { %1091 = vmatpush3.bf16.msra.mxu0 %v1474_v9 }
 0x242   :  { %1116 = vmatprep.subr.bf16.mxu0 %v1309_v42 }
 0x243   :  { %1139 = vmatpush3.bf16.msra.mxu1 %v1408_v44 }
 0x244   :  { %1093 = vmatmul.mubr.bf16.vlgmr.msra.gmra.mxu0 %v1553_v14  ;;  %1140 = vmatprep.subr.bf16.mxu1 %v1309_v42 }
 0x245   :  { %1117 = vmatpush3.bf16.msra.mxu0 %v1399_v43  ;;  %1132 = vmatprep.mubr.msk.bf16.mxu0 %vm1312_vm3, %v1309_v42 }
 0x246   :  { %1118 = vmatprep.subr.bf16.mxu0 %v1309_v42 }
 0x247   :  { %1141 = vmatpush3.bf16.msra.mxu1 %v1418_v47 }
 0x248   :  { %1142 = vmatprep.subr.bf16.mxu1 %v1309_v42 }
 0x249   :  { %1119 = vmatpush3.bf16.msra.mxu0 %v1408_v44 }
 0x24a   :  { %1120 = vmatprep.subr.bf16.mxu0 %v1309_v42 }
 0x24b   :  { %1143 = vmatpush3.bf16.msra.mxu1 %v1431_v51 }
 0x24c   :  { %1144 = vmatprep.subr.bf16.mxu1 %v1309_v42 }
 0x24d   :  { %1121 = vmatpush3.bf16.msra.mxu0 %v1418_v47 }
 0x24e   :  { %1122 = vmatprep.subr.bf16.mxu0 %v1309_v42 }
 0x24f   :  { %1145 = vmatpush3.bf16.msra.mxu1 %v1444_v56 }
 0x250   :  { %1146 = vmatprep.subr.bf16.mxu1 %v1309_v42 }
 0x251   :  { %1123 = vmatpush3.bf16.msra.mxu0 %v1431_v51 }
 0x252   :  { %1124 = vmatprep.subr.bf16.mxu0 %v1309_v42 }
 0x253   :  { %1147 = vmatpush3.bf16.msra.mxu1 %v1452_v60 }
 0x254   :  { %1148 = vmatprep.subr.bf16.mxu1 %v1309_v42 }
 0x255   :  { %1125 = vmatpush3.bf16.msra.mxu0 %v1444_v56 }
 0x256   :  { %1126 = vmatprep.subr.bf16.mxu0 %v1309_v42 }
 0x257   :  { %1149 = vmatpush3.bf16.msra.mxu1 %v1465_v6 }
 0x258   :  { %1150 = vmatprep.subr.bf16.mxu1 %v1309_v42 }
 0x259   :  { %1127 = vmatpush3.bf16.msra.mxu0 %v1452_v60 }
 0x25a   :  { %1128 = vmatprep.subr.bf16.mxu0 %v1309_v42 }
 0x25b   :  { %1151 = vmatpush3.bf16.msra.mxu1 %v1474_v9 }
 0x25c   :  { %1176 = vmatprep.subr.bf16.mxu1 %v1309_v42 }
 0x25d   :  { %1129 = vmatpush3.bf16.msra.mxu0 %v1465_v6 }
 0x25e   :  { %1153 = vmatmul.mubr.bf16.vlgmr.msra.gmra.mxu1 %v1502_v40  ;;  %1130 = vmatprep.subr.bf16.mxu0 %v1309_v42 }
 0x25f   :  { %1177 = vmatpush3.bf16.msra.mxu1 %v1399_v43  ;;  %1192 = vmatprep.mubr.msk.bf16.mxu1 %vm1312_vm3, %v1309_v42 }
 0x260   :  { %1178 = vmatprep.subr.bf16.mxu1 %v1309_v42 }
 0x261   :  { %1131 = vmatpush3.bf16.msra.mxu0 %v1474_v9 }
 0x262   :  { %1156 = vmatprep.subr.bf16.mxu0 %v1309_v42 }
 0x263   :  { %1179 = vmatpush3.bf16.msra.mxu1 %v1408_v44 }
 0x264   :  { %1133 = vmatmul.mubr.bf16.vlgmr.msra.gmra.mxu0 %v1521_v53  ;;  %1180 = vmatprep.subr.bf16.mxu1 %v1309_v42 }
 0x265   :  { %1157 = vmatpush3.bf16.msra.mxu0 %v1399_v43  ;;  %1172 = vmatprep.mubr.msk.bf16.mxu0 %vm1312_vm3, %v1309_v42 }
 0x266   :  { %1158 = vmatprep.subr.bf16.mxu0 %v1309_v42 }
 0x267   :  { %1181 = vmatpush3.bf16.msra.mxu1 %v1418_v47 }
 0x268   :  { %1182 = vmatprep.subr.bf16.mxu1 %v1309_v42 }
 0x269   :  { %1159 = vmatpush3.bf16.msra.mxu0 %v1408_v44 }
 0x26a   :  { %1160 = vmatprep.subr.bf16.mxu0 %v1309_v42 }
 0x26b   :  { %1183 = vmatpush3.bf16.msra.mxu1 %v1431_v51 }
 0x26c   :  { %1184 = vmatprep.subr.bf16.mxu1 %v1309_v42 }
 0x26d   :  { %1161 = vmatpush3.bf16.msra.mxu0 %v1418_v47 }
 0x26e   :  { %1162 = vmatprep.subr.bf16.mxu0 %v1309_v42 }
 0x26f   :  { %1185 = vmatpush3.bf16.msra.mxu1 %v1444_v56 }
 0x270   :  { %1186 = vmatprep.subr.bf16.mxu1 %v1309_v42 }
 0x271   :  { %1163 = vmatpush3.bf16.msra.mxu0 %v1431_v51 }
 0x272   :  { %1164 = vmatprep.subr.bf16.mxu0 %v1309_v42 }
 0x273   :  { %1187 = vmatpush3.bf16.msra.mxu1 %v1452_v60 }
 0x274   :  { %1188 = vmatprep.subr.bf16.mxu1 %v1309_v42 }
 0x275   :  { %1165 = vmatpush3.bf16.msra.mxu0 %v1444_v56 }
 0x276   :  { %1166 = vmatprep.subr.bf16.mxu0 %v1309_v42 }
 0x277   :  { %1189 = vmatpush3.bf16.msra.mxu1 %v1465_v6 }
 0x278   :  { %1190 = vmatprep.subr.bf16.mxu1 %v1309_v42 }
 0x279   :  { %1167 = vmatpush3.bf16.msra.mxu0 %v1452_v60 }
 0x27a   :  { %1168 = vmatprep.subr.bf16.mxu0 %v1309_v42 }
 0x27b   :  { %1191 = vmatpush3.bf16.msra.mxu1 %v1474_v9 }
 0x27c   :  { %1216 = vmatprep.subr.bf16.mxu1 %v1309_v42 }
 0x27d   :  { %1169 = vmatpush3.bf16.msra.mxu0 %v1465_v6 }
 0x27e   :  { %1193 = vmatmul.mubr.bf16.vlgmr.msra.gmra.mxu1 %v1546_v11  ;;  %1170 = vmatprep.subr.bf16.mxu0 %v1309_v42 }
 0x27f   :  { %1217 = vmatpush3.bf16.msra.mxu1 %v1399_v43  ;;  %1232 = vmatprep.mubr.msk.bf16.mxu1 %vm1312_vm3, %v1309_v42 }
 0x280   :  { %1218 = vmatprep.subr.bf16.mxu1 %v1309_v42 }
 0x281   :  { %1171 = vmatpush3.bf16.msra.mxu0 %v1474_v9 }
 0x282   :  { %1196 = vmatprep.subr.bf16.mxu0 %v1309_v42 }
 0x283   :  { %1219 = vmatpush3.bf16.msra.mxu1 %v1408_v44 }
 0x284   :  { %1173 = vmatmul.mubr.bf16.vlgmr.msra.gmra.mxu0 %v618_v7  ;;  %1220 = vmatprep.subr.bf16.mxu1 %v1309_v42 }
 0x285   :  { %1197 = vmatpush3.bf16.msra.mxu0 %v1399_v43  ;;  %1212 = vmatprep.mubr.msk.bf16.mxu0 %vm1312_vm3, %v1309_v42 }
 0x286   :  { %1198 = vmatprep.subr.bf16.mxu0 %v1309_v42 }
 0x287   :  { %1221 = vmatpush3.bf16.msra.mxu1 %v1418_v47 }
 0x288   :  { %1222 = vmatprep.subr.bf16.mxu1 %v1309_v42 }
 0x289   :  { %1199 = vmatpush3.bf16.msra.mxu0 %v1408_v44 }
 0x28a   :  { %1200 = vmatprep.subr.bf16.mxu0 %v1309_v42 }
 0x28b   :  { %1223 = vmatpush3.bf16.msra.mxu1 %v1431_v51 }
 0x28c   :  { %1224 = vmatprep.subr.bf16.mxu1 %v1309_v42 }
 0x28d   :  { %1201 = vmatpush3.bf16.msra.mxu0 %v1418_v47 }
 0x28e   :  { %1202 = vmatprep.subr.bf16.mxu0 %v1309_v42 }
 0x28f   :  { %1225 = vmatpush3.bf16.msra.mxu1 %v1444_v56 }
 0x290   :  { %1226 = vmatprep.subr.bf16.mxu1 %v1309_v42 }
 0x291   :  { %1203 = vmatpush3.bf16.msra.mxu0 %v1431_v51 }
 0x292   :  { %1204 = vmatprep.subr.bf16.mxu0 %v1309_v42 }
 0x293   :  { %1227 = vmatpush3.bf16.msra.mxu1 %v1452_v60 }
 0x294   :  { %1228 = vmatprep.subr.bf16.mxu1 %v1309_v42 }
 0x295   :  { %1205 = vmatpush3.bf16.msra.mxu0 %v1444_v56 }
 0x296   :  { %1206 = vmatprep.subr.bf16.mxu0 %v1309_v42 }
 0x297   :  { %1229 = vmatpush3.bf16.msra.mxu1 %v1465_v6 }
 0x298   :  { %1230 = vmatprep.subr.bf16.mxu1 %v1309_v42 }
 0x299   :  { %1207 = vmatpush3.bf16.msra.mxu0 %v1452_v60 }
 0x29a   :  { %1208 = vmatprep.subr.bf16.mxu0 %v1309_v42 }
 0x29b   :  { %1231 = vmatpush3.bf16.msra.mxu1 %v1474_v9 }
 0x29d   :  { %1209 = vmatpush3.bf16.msra.mxu0 %v1465_v6 }
 0x29e   :  { %1233 = vmatmul.mubr.bf16.vlgmr.msra.gmra.mxu1 %v756_v17  ;;  %1210 = vmatprep.subr.bf16.mxu0 %v1309_v42 }
 0x2a1   :  { %1211 = vmatpush3.bf16.msra.mxu0 %v1474_v9 }
 0x2a4   :  { %1213 = vmatmul.mubr.bf16.vlgmr.msra.gmra.mxu0 %v1530_v59 }
 0x2be   :  { %v337_v43 = vpop.f32.mrf.mxu1 }
 0x2c0   :  { %v1034_v44 = vpop.f32.mrf.mxu1 }
 0x2c2   :  { %v340_v47 = vpop.f32.mrf.mxu1 }
 0x2c4   :  { %v296_v51 = vpop.f32.mrf.mxu0  ;;  %v1035_v56 = vpop.f32.mrf.mxu1 }
 0x2c5   :  { %v338_v60 = vadd.f32 %v337_v43, %v296_v51 }
 0x2c6   :  { %v1014_v31 = vpop.f32.mrf.mxu0 }
 0x2c8   :  { %v299_v32 = vpop.f32.mrf.mxu0 }
 0x2c9   :  { %v341_v1 = vadd.f32 %v340_v47, %v299_v32 }
 0x2ca   :  { %v1015_v6 = vpop.f32.mrf.mxu0 }
 0x2de   :  { %v432_v33 = vpop.f32.mrf.mxu1 }
 0x2e0   :  { %v1074_v34 = vpop.f32.mrf.mxu1 }
 0x2e2   :  { %v435_v35 = vpop.f32.mrf.mxu1 }
 0x2e4   :  { %v379_v36 = vpop.f32.mrf.mxu0  ;;  %v1075_v37 = vpop.f32.mrf.mxu1 }
 0x2e5   :  { %v386_v38 = vadd.f32 %v379_v36, %v338_v60 }
 0x2e6   :  { %v1054_v39 = vpop.f32.mrf.mxu0 }
 0x2e7   :  { %1265 = vrcp.f32 %v386_v38 }
 0x2e8   :  { %v382_v9 = vpop.f32.mrf.mxu0 }
 0x2e9   :  { %v387_v40 = vadd.f32 %v382_v9, %v341_v1 }
 0x2ea   :  { %v1055_v2 = vpop.f32.mrf.mxu0 }
 0x2eb   :  { %1267 = vrcp.f32 %v387_v40 }
 0x2ec   :  { %1269 = vlog2.f32 %v386_v38 }
 0x2f4   :  { %v1266_v17 = vpop.eup %1265 }
 0x2f8   :  { %v1268_v5 = vpop.eup %1267 }
 0x2f9   :  { %v1270_v30 = vpop.eup %1269 }
 0x2fa   :  { %v811_v1 = vmul.f32 0.6931472, %v1270_v30 }
 0x2fe   :  { %v515_v3 = vpop.f32.mrf.mxu1 }
 0x300   :  { %v1114_v41 = vpop.f32.mrf.mxu1 }
 0x302   :  { %v518_v45 = vpop.f32.mrf.mxu1 }
 0x304   :  { %v473_v46 = vpop.f32.mrf.mxu0  ;;  %v1115_v48 = vpop.f32.mrf.mxu1 }
 0x305   :  { %v474_v49 = vadd.f32 %v473_v46, %v432_v33 }
 0x306   :  { %v1094_v50 = vpop.f32.mrf.mxu0 }
 0x307   :  { %v522_v52 = vadd.f32 %v515_v3, %v474_v49 }
 0x308   :  { %v476_v53 = vpop.f32.mrf.mxu0 }
 0x309   :  { %v477_v54 = vadd.f32 %v476_v53, %v435_v35  ;;  %1271 = vrcp.f32 %v522_v52 }
 0x30a   :  { %v1095_v55 = vpop.f32.mrf.mxu0  ;;  %1273 = vlog2.f32 %v522_v52 }
 0x30b   :  { %v523_v57 = vadd.f32 %v518_v45, %v477_v54  ;;  %1275 = vlog2.f32 %v387_v40  ;;  %v822_v55 = vld [vmem:[#allocation2] sm:$0x1] }
 0x30d   :  { %1277 = vrcp.f32 %v523_v57 }
 0x30e   :  { %1279 = vlog2.f32 %v523_v57 }
 0x316   :  { %v1272_v44 = vpop.eup %1271 }
 0x317   :  { %v1274_v60 = vpop.eup %1273 }
 0x318   :  { %v1276_v32 = vpop.eup %1275  ;;  %v817_v35 = vmul.f32 0.6931472, %v1274_v60 }
 0x319   :  { %v813_v39 = vmul.f32 0.6931472, %v1276_v32 }
 0x31a   :  { %v1278_v34 = vpop.eup %1277 }
 0x31b   :  { %v1280_v38 = vpop.eup %1279 }
 0x31c   :  { %v819_v2 = vmul.f32 0.6931472, %v1280_v38 }
 0x31e   :  { %v611_v58 = vpop.f32.mrf.mxu1 }
 0x320   :  { %v1154_v59 = vpop.f32.mrf.mxu1 }
 0x322   :  { %v614_v61 = vpop.f32.mrf.mxu1 }
 0x324   :  { %v570_v62 = vpop.f32.mrf.mxu0  ;;  %v1155_v63 = vpop.f32.mrf.mxu1 }
 0x325   :  { %v612_v4 = vadd.f32 %v611_v58, %v570_v62 }
 0x326   :  { %v1134_v7 = vpop.f32.mrf.mxu0 }
 0x328   :  { %v573_v42 = vpop.f32.mrf.mxu0 }
 0x329   :  { %v615_v8 = vadd.f32 %v614_v61, %v573_v42 }
 0x32a   :  { %v1135_v10 = vpop.f32.mrf.mxu0 }
 0x33e   :  { %v708_v11 = vpop.f32.mrf.mxu1 }
 0x340   :  { %v1194_v12 = vpop.f32.mrf.mxu1 }
 0x342   :  { %v711_v13 = vpop.f32.mrf.mxu1 }
 0x344   :  { %v653_v14 = vpop.f32.mrf.mxu0  ;;  %v1195_v15 = vpop.f32.mrf.mxu1 }
 0x345   :  { %v660_v16 = vadd.f32 %v653_v14, %v612_v4 }
 0x346   :  { %v1174_v18 = vpop.f32.mrf.mxu0 }
 0x347   :  { %v802_v19 = vmul.f32 %v1266_v17, %v660_v16 }
 0x348   :  { %v656_v20 = vpop.f32.mrf.mxu0 }
 0x349   :  { %v661_v21 = vadd.f32 %v656_v20, %v615_v8 }
 0x34a   :  { %v1175_v22 = vpop.f32.mrf.mxu0 }
 0x34b   :  { %v803_v23 = vmul.f32 %v1268_v5, %v661_v21 }
 0x35e   :  { %v791_v24 = vpop.f32.mrf.mxu1 }
 0x360   :  { %v1234_v25 = vpop.f32.mrf.mxu1 }
 0x362   :  { %v794_v26 = vpop.f32.mrf.mxu1 }
 0x364   :  { %v749_v27 = vpop.f32.mrf.mxu0  ;;  %v1235_v0 = vpop.f32.mrf.mxu1 }
 0x365   :  { %v750_v28 = vadd.f32 %v749_v27, %v708_v11 }
 0x366   :  { %v1214_v29 = vpop.f32.mrf.mxu0 }
 0x367   :  { %v798_v43 = vadd.f32 %v791_v24, %v750_v28 }
 0x368   :  { %v752_v47 = vpop.f32.mrf.mxu0 }
 0x369   :  { %v806_v51 = vmul.f32 %v1272_v44, %v798_v43  ;;  %v753_v56 = vadd.f32 %v752_v47, %v711_v13 }
 0x36a   :  { %v1215_v31 = vpop.f32.mrf.mxu0 }
 0x36b   :  { %v808_v6 = vadd.f32 %v806_v51, %v802_v19  ;;  %v799_v33 = vadd.f32 %v794_v26, %v753_v56 }
 0x36d   :  { %v814_v36 = vsub.f32 %v808_v6, %v811_v1  ;;  %v807_v37 = vmul.f32 %v1278_v34, %v799_v33 }
 0x36f   :  { %v820_v9 = vsub.f32 %v814_v36, %v817_v35  ;;  %v809_v40 = vadd.f32 %v807_v37, %v803_v23 }
 0x371   :  { %v815_v3 = vsub.f32 %v809_v40, %v813_v39  ;;  %v824_v45 = vsel %vm823_vm6, %v820_v9, 0.0 }
 0x373   :  { %v821_v41 = vsub.f32 %v815_v3, %v819_v2 }
 0x375   :  { %v825_v46 = vsel %vm823_vm6, %v821_v41, 0.0 }
 0x376   :  { %v826_v48 = vadd.f32 %v825_v46, %v824_v45 }
 0x378   :  { %v827_v49 = vrot.slane %v826_v48, 4 }
 0x37a   :  { %v828_v50 = vadd.f32 %v827_v49, %v826_v48 }
 0x37c   :  { %v829_v52 = vrot.slane %v828_v50, 2 }
 0x37e   :  { %v830_v53 = vadd.f32 %v829_v52, %v828_v50 }
 0x380   :  { %v831_v54 = vrot.slane %v830_v53, 1 }
 0x382   :  { %v832_v57 = vadd.f32 %v831_v54, %v830_v53 }
 0x384   :  { %v833_v58 = vadd.f32 %v832_v57, %v822_v55 }
 0x386   :  { %835 = vst.msk [vmem:[#allocation2] sm:$0x1] %vm64_vm5, %v833_v58 }
 0x38d   :  { %v839_v59 = vld [vmem:[#allocation2] sm:$0x1] }
 0x38e   :  { %v840_v61 = vsel %vm64_vm5, %v839_v59, 0.0 }
 0x38f   :  { %841 = vadd.xlane.f32.xlu0 %v840_v61 }
 0x418   :  { %v842_v62 = vpop.xlane.xlu0 %841 }
 0x419   :  { %v843_v63 = vrot.slane %v842_v62, 4 }
 0x41b   :  { %v844_v4 = vadd.f32 %v843_v63, %v842_v62 }
 0x41d   :  { %v845_v7 = vrot.slane %v844_v4, 2 }
 0x41f   :  { %v846_v42 = vadd.f32 %v845_v7, %v844_v4 }
 0x421   :  { %v847_v8 = vrot.slane %v846_v42, 1 }
 0x423   :  { %v848_v10 = vadd.f32 %v847_v8, %v846_v42 }
 0x425   :  { %1236 = vpush %v848_v10 }
 0x456   :  { %s1237_s16 = spop %1236 }
 0x457   :  { %v850_v11 = vstv %s1237_s16 }
 0x458   :  { %v851_v12 = vmul.f32 -0.00024414063, %v850_v11 }
 0x45a   :  { %853 = vst.msk [vmem:[#allocation3] sm:$0x1] %vm852_vm7, %v851_v12 }
 0x45b   :  { %1292 = shalt.err (!%p1289_p4)
}
 0x45c   :  { %863 = dma.vmem_to_hbm [thread:$0]  %s861_s15, 16, %s1746_s3, [#allocation4]  }
 0x45d   :  { %1301 = dma.done.wait [#allocation4], 16  }
 0x45e   :  { %1302 = vsyncadd [#allocation4], 4294967280 }
 0x45f   :  { %867 = vsyncpa [#allocation4], 1 }

</bundles_post_ra>
